<compile_context>
chip_gen: v7x
topology: tpu7x:2x2x1
jax: 0.10.0
libtpu: 0.0.40
codegen_flags: <defaults>
</compile_context>

<pallas_src>
import functools

import jax
import jax.numpy as jnp
import numpy as np
from jax.experimental import pallas as pl
from jax.experimental.pallas import tpu as pltpu

NUM_HEADS = 8
RE_SCALE = 0.5


def _re_attention_kernel(x_ref, wqkv_ref, wproj_ref, bproj_ref, out_ref, *,
                         B, N, H, scale, re_scale):
    """Fused QKV proj + head-to-head attention + proj + ReAttention reweight.

    Inputs:
      x_ref     : (B*N, C)   tokens (C == H, head_dim == 1)
      wqkv_ref  : (C, 3C)
      wproj_ref : (C, C)
      bproj_ref : (1, C)
    Output:
      out_ref   : (B*B*N, C) rows ordered (b0, b1, n); wrapper reshapes to
                  (B, B, N, C).
    """
    C = H                                   # head_dim == 1, enforced by wrapper
    x = x_ref[...].astype(jnp.float32)                      # (T, C), T = B*N
    w_qkv = wqkv_ref[...].astype(jnp.float32)               # (C, 3C)
    w_proj = wproj_ref[...].astype(jnp.float32)             # (C, C)
    b_proj = bproj_ref[...].astype(jnp.float32)             # (1, C)

    # --- fused QKV projection (single MXU matmul) ----------------------------
    qkv = jnp.dot(x, w_qkv, preferred_element_type=jnp.float32)   # (T, 3C)
    q = qkv[:, 0 * C:1 * C]                                  # (T, H)
    k = qkv[:, 1 * C:2 * C]                                  # (T, H)
    v = qkv[:, 2 * C:3 * C]                                  # (T, H)

    # --- per-token head-to-head attention (faithful PyTorch quirk) -----------
    # attn[t, h, g] = scale * q[t, h] * k[t, g]   (head_dim == 1)
    attn = (q[:, :, None] * k[:, None, :]) * scale           # (T, H, H)
    attn = attn - jnp.max(attn, axis=-1, keepdims=True)
    attn = jnp.exp(attn)
    denom = jnp.sum(attn, axis=-1, keepdims=True)            # (T, H, 1)
    inv = pl.reciprocal(denom, approx=True)                  # EUP slot
    inv = inv * (2.0 - denom * inv)                          # 1 Newton step -> ~exact
    attn = attn * inv

    # ctx[t, h] = sum_g attn[t, h, g] * v[t, g]
    ctx = jnp.sum(attn * v[:, None, :], axis=-1)             # (T, H)

    # --- torch's (attn @ v).transpose(1, 2).reshape(B, N, C) -----------------
    # With D == 1 and N == H == C this is a per-batch (N, H) transpose.
    # Done on the MXU as  eye @ ctx_b^T  using an rhs-transposed contraction
    # (the standard q @ k.T pattern), which lowers robustly on Mosaic.
    rows_i = jax.lax.broadcasted_iota(jnp.int32, (N, N), 0)
    cols_i = jax.lax.broadcasted_iota(jnp.int32, (N, N), 1)
    eye = (rows_i == cols_i).astype(jnp.float32)             # (N, N)
    t_dims = (((1,), (1,)), ((), ()))                        # contract lanes of both
    ctx_t = jnp.concatenate(
        [jax.lax.dot_general(eye, ctx[b * N:(b + 1) * N, :], t_dims,
                             preferred_element_type=jnp.float32)
         for b in range(B)], axis=0)                          # (T, C)

    # --- output projection ----------------------------------------------------
    out = jnp.dot(ctx_t, w_proj, preferred_element_type=jnp.float32) + b_proj  # (T, C)

    # --- reweighting: result[b0, b1, n, c] = asum[b0, n, c] * out[b1*N+n, c] --
    # asum[b0] = re_scale * sum_n attn[b0, n, :, :]   -> (H, H) == (N, C)
    blocks = []
    for b0 in range(B):
        asum_b0 = re_scale * jnp.sum(attn[b0 * N:(b0 + 1) * N], axis=0)  # (N, C)
        for b1 in range(B):
            blocks.append(asum_b0 * out[b1 * N:(b1 + 1) * N, :])         # (N, C)
    out_ref[...] = jnp.concatenate(blocks, axis=0).astype(out_ref.dtype)


def re_attention(x, w_qkv, w_proj, b_proj, *, num_heads=NUM_HEADS, re_scale=RE_SCALE):
    B, N, C = x.shape
    H = num_heads
    if C % H != 0:
        raise ValueError("dim must be divisible by num_heads")
    D = C // H
    # The module's final broadcast x * (attn*re_scale).sum(1, keepdim=True)
    # only type-checks when N == C == num_heads (=> head_dim == 1).
    if not (N == C == H and D == 1):
        raise ValueError("ReAttention requires N == C == num_heads")
    scale = float(D) ** -0.5

    vmem = pl.BlockSpec(memory_space=pltpu.MemorySpace.VMEM)
    kernel = functools.partial(
        _re_attention_kernel, B=B, N=N, H=H, scale=scale, re_scale=re_scale)

    out2d = pl.pallas_call(
        kernel,
        out_shape=jax.ShapeDtypeStruct((B * B * N, C), jnp.float32),
        in_specs=[vmem, vmem, vmem, vmem],
        out_specs=vmem,
    )(x.reshape(B * N, C), w_qkv, w_proj, b_proj.reshape(1, C))

    return out2d.reshape(B, B, N, C)


def re_attention_ref(x, w_qkv, w_proj, b_proj, num_heads=NUM_HEADS, re_scale=RE_SCALE):
    """Pure-JAX mirror of the PyTorch forward (for validation)."""
    B, N, C = x.shape
    H = num_heads
    D = C // H
    scale = float(D) ** -0.5
    qkv = (x @ w_qkv).reshape(B, N, 3, H, D)
    q, k, v = qkv[:, :, 0], qkv[:, :, 1], qkv[:, :, 2]
    attn = jnp.einsum("bnhd,bngd->bnhg", q, k) * scale
    attn = jax.nn.softmax(attn, axis=-1)
    out = jnp.einsum("bnhg,bngd->bnhd", attn, v)
    out = jnp.transpose(out, (0, 2, 1, 3)).reshape(B, N, C)
    out = out @ w_proj + b_proj
    asum = (attn * re_scale).sum(axis=1, keepdims=True)   # (B, 1, H, H)
    return out * asum                                     # broadcasts to (B, B, N, C)


if __name__ == "__main__":
    # N == dim == num_heads is required for the module's final broadcast.
    B, N, dim = 2, 8, 8

    key = jax.random.PRNGKey(0)
    kx, kq, kp, kb = jax.random.split(key, 4)
    x = jax.random.normal(kx, (B, N, dim), dtype=jnp.float32)
    # Deterministic synthetic parameters (qkv has no bias: qkv_bias=False).
    w_qkv = jax.random.normal(kq, (dim, 3 * dim), dtype=jnp.float32) * 0.1
    w_proj = jax.random.normal(kp, (dim, dim), dtype=jnp.float32) * 0.1
    b_proj = jax.random.normal(kb, (dim,), dtype=jnp.float32) * 0.1

    out = jax.block_until_ready(jax.jit(re_attention)(x, w_qkv, w_proj, b_proj))
    ref = re_attention_ref(x, w_qkv, w_proj, b_proj)
    # Tolerance leaves headroom for the EUP approx-reciprocal (+ Newton step)
    # in the softmax; structural/layout errors would be O(1) mismatches.
    np.testing.assert_allclose(np.asarray(out), np.asarray(ref), rtol=1e-3, atol=1e-4)
    assert out.shape == (B, B, N, dim)
    print("KERNEL_OK")
</pallas_src>

<mosaic_0001>
module attributes {stable_mosaic.version = 11 : i64} {
  func.func @_re_attention_kernel(%arg0: memref<16x8xf32, #tpu.memory_space<vmem>>, %arg1: memref<8x24xf32, #tpu.memory_space<vmem>>, %arg2: memref<8x8xf32, #tpu.memory_space<vmem>>, %arg3: memref<1x8xf32, #tpu.memory_space<vmem>>, %arg4: memref<32x8xf32, #tpu.memory_space<vmem>>) attributes {dimension_semantics = [], scalar_prefetch = 0 : i64, scratch_operands = 0 : i64, tpu.core_type = #tpu.core_type<tc>} {
    %c0 = arith.constant 0 : index
    %c0_0 = arith.constant 0 : index
    %0 = vector.load %arg0[%c0, %c0_0] : memref<16x8xf32, #tpu.memory_space<vmem>>, vector<16x8xf32>
    %c0_1 = arith.constant 0 : index
    %c0_2 = arith.constant 0 : index
    %1 = vector.load %arg1[%c0_1, %c0_2] : memref<8x24xf32, #tpu.memory_space<vmem>>, vector<8x24xf32>
    %c0_3 = arith.constant 0 : index
    %c0_4 = arith.constant 0 : index
    %2 = vector.load %arg2[%c0_3, %c0_4] : memref<8x8xf32, #tpu.memory_space<vmem>>, vector<8x8xf32>
    %c0_5 = arith.constant 0 : index
    %c0_6 = arith.constant 0 : index
    %3 = vector.load %arg3[%c0_5, %c0_6] : memref<1x8xf32, #tpu.memory_space<vmem>>, vector<1x8xf32>
    %cst = arith.constant dense<0.000000e+00> : vector<16x24xf32>
    %4 = tpu.matmul %0, %1, %cst {dimension_numbers = #tpu.dot_dimension_numbers<[1], [0], [0], [1], [0, 0, 1, 1], [], []>} : vector<16x8xf32>, vector<8x24xf32>, vector<16x24xf32> -> vector<16x24xf32>
    %5 = vector.extract_strided_slice %4 {offsets = [0, 0], sizes = [16, 8], strides = [1, 1]} : vector<16x24xf32> to vector<16x8xf32>
    %6 = vector.extract_strided_slice %4 {offsets = [0, 8], sizes = [16, 8], strides = [1, 1]} : vector<16x24xf32> to vector<16x8xf32>
    %7 = vector.extract_strided_slice %4 {offsets = [0, 16], sizes = [16, 8], strides = [1, 1]} : vector<16x24xf32> to vector<16x8xf32>
    %8 = vector.shape_cast %5 : vector<16x8xf32> to vector<16x8x1xf32>
    %9 = vector.shape_cast %6 : vector<16x8xf32> to vector<16x1x8xf32>
    %10 = vector.broadcast %8 : vector<16x8x1xf32> to vector<16x8x8xf32>
    %11 = vector.broadcast %9 : vector<16x1x8xf32> to vector<16x8x8xf32>
    %12 = arith.mulf %10, %11 : vector<16x8x8xf32>
    %cst_7 = arith.constant 1.000000e+00 : f32
    %13 = vector.broadcast %cst_7 : f32 to vector<16x8x8xf32>
    %14 = arith.mulf %12, %13 : vector<16x8x8xf32>
    %cst_8 = arith.constant dense<0xFF800000> : vector<16x8xf32>
    %15 = vector.multi_reduction <maximumf>, %14, %cst_8 [2] : vector<16x8x8xf32> to vector<16x8xf32>
    %16 = vector.shape_cast %15 : vector<16x8xf32> to vector<16x8x1xf32>
    %17 = vector.broadcast %16 : vector<16x8x1xf32> to vector<16x8x8xf32>
    %18 = arith.subf %14, %17 : vector<16x8x8xf32>
    %19 = math.exp %18 : vector<16x8x8xf32>
    %cst_9 = arith.constant dense<0.000000e+00> : vector<16x8xf32>
    %20 = vector.multi_reduction <add>, %19, %cst_9 [2] : vector<16x8x8xf32> to vector<16x8xf32>
    %21 = vector.shape_cast %20 : vector<16x8xf32> to vector<16x8x1xf32>
    %22 = tpu.reciprocal %21 {approx = true} : vector<16x8x1xf32> -> vector<16x8x1xf32>
    %23 = arith.mulf %21, %22 : vector<16x8x1xf32>
    %cst_10 = arith.constant 2.000000e+00 : f32
    %24 = vector.broadcast %cst_10 : f32 to vector<16x8x1xf32>
    %25 = arith.subf %24, %23 : vector<16x8x1xf32>
    %26 = arith.mulf %22, %25 : vector<16x8x1xf32>
    %27 = vector.broadcast %26 : vector<16x8x1xf32> to vector<16x8x8xf32>
    %28 = arith.mulf %19, %27 : vector<16x8x8xf32>
    %29 = vector.shape_cast %7 : vector<16x8xf32> to vector<16x1x8xf32>
    %30 = vector.broadcast %29 : vector<16x1x8xf32> to vector<16x8x8xf32>
    %31 = arith.mulf %28, %30 : vector<16x8x8xf32>
    %cst_11 = arith.constant dense<0.000000e+00> : vector<16x8xf32>
    %32 = vector.multi_reduction <add>, %31, %cst_11 [2] : vector<16x8x8xf32> to vector<16x8xf32>
    %33 = tpu.iota {dimensions = array<i32: 0>} : vector<8x8xi32>
    %34 = tpu.iota {dimensions = array<i32: 1>} : vector<8x8xi32>
    %35 = arith.cmpi eq, %33, %34 : vector<8x8xi32>
    %36 = arith.extui %35 : vector<8x8xi1> to vector<8x8xi32>
    %37 = arith.sitofp %36 : vector<8x8xi32> to vector<8x8xf32>
    %38 = vector.extract_strided_slice %32 {offsets = [0, 0], sizes = [8, 8], strides = [1, 1]} : vector<16x8xf32> to vector<8x8xf32>
    %cst_12 = arith.constant dense<0.000000e+00> : vector<8x8xf32>
    %39 = tpu.matmul %37, %38, %cst_12 {dimension_numbers = #tpu.dot_dimension_numbers<[1], [1], [0], [0], [0, 0, 1, 0], [], []>} : vector<8x8xf32>, vector<8x8xf32>, vector<8x8xf32> -> vector<8x8xf32>
    %40 = vector.extract_strided_slice %32 {offsets = [8, 0], sizes = [8, 8], strides = [1, 1]} : vector<16x8xf32> to vector<8x8xf32>
    %cst_13 = arith.constant dense<0.000000e+00> : vector<8x8xf32>
    %41 = tpu.matmul %37, %40, %cst_13 {dimension_numbers = #tpu.dot_dimension_numbers<[1], [1], [0], [0], [0, 0, 1, 0], [], []>} : vector<8x8xf32>, vector<8x8xf32>, vector<8x8xf32> -> vector<8x8xf32>
    %42 = tpu.concatenate %39, %41 in 0 : vector<8x8xf32>, vector<8x8xf32> -> vector<16x8xf32>
    %cst_14 = arith.constant dense<0.000000e+00> : vector<16x8xf32>
    %43 = tpu.matmul %42, %2, %cst_14 {dimension_numbers = #tpu.dot_dimension_numbers<[1], [0], [0], [1], [0, 0, 1, 1], [], []>} : vector<16x8xf32>, vector<8x8xf32>, vector<16x8xf32> -> vector<16x8xf32>
    %44 = vector.broadcast %3 : vector<1x8xf32> to vector<16x8xf32>
    %45 = arith.addf %43, %44 : vector<16x8xf32>
    %46 = vector.extract_strided_slice %28 {offsets = [0, 0, 0], sizes = [8, 8, 8], strides = [1, 1, 1]} : vector<16x8x8xf32> to vector<8x8x8xf32>
    %cst_15 = arith.constant dense<0.000000e+00> : vector<8x8xf32>
    %47 = vector.multi_reduction <add>, %46, %cst_15 [0] : vector<8x8x8xf32> to vector<8x8xf32>
    %cst_16 = arith.constant 5.000000e-01 : f32
    %48 = vector.broadcast %cst_16 : f32 to vector<8x8xf32>
    %49 = arith.mulf %48, %47 : vector<8x8xf32>
    %50 = vector.extract_strided_slice %45 {offsets = [0, 0], sizes = [8, 8], strides = [1, 1]} : vector<16x8xf32> to vector<8x8xf32>
    %51 = arith.mulf %49, %50 : vector<8x8xf32>
    %52 = vector.extract_strided_slice %45 {offsets = [8, 0], sizes = [8, 8], strides = [1, 1]} : vector<16x8xf32> to vector<8x8xf32>
    %53 = arith.mulf %49, %52 : vector<8x8xf32>
    %54 = vector.extract_strided_slice %28 {offsets = [8, 0, 0], sizes = [8, 8, 8], strides = [1, 1, 1]} : vector<16x8x8xf32> to vector<8x8x8xf32>
    %cst_17 = arith.constant dense<0.000000e+00> : vector<8x8xf32>
    %55 = vector.multi_reduction <add>, %54, %cst_17 [0] : vector<8x8x8xf32> to vector<8x8xf32>
    %cst_18 = arith.constant 5.000000e-01 : f32
    %56 = vector.broadcast %cst_18 : f32 to vector<8x8xf32>
    %57 = arith.mulf %56, %55 : vector<8x8xf32>
    %58 = vector.extract_strided_slice %45 {offsets = [0, 0], sizes = [8, 8], strides = [1, 1]} : vector<16x8xf32> to vector<8x8xf32>
    %59 = arith.mulf %57, %58 : vector<8x8xf32>
    %60 = vector.extract_strided_slice %45 {offsets = [8, 0], sizes = [8, 8], strides = [1, 1]} : vector<16x8xf32> to vector<8x8xf32>
    %61 = arith.mulf %57, %60 : vector<8x8xf32>
    %62 = tpu.concatenate %51, %53, %59, %61 in 0 : vector<8x8xf32>, vector<8x8xf32>, vector<8x8xf32>, vector<8x8xf32> -> vector<32x8xf32>
    %c0_19 = arith.constant 0 : index
    %c0_20 = arith.constant 0 : index
    %63 = vector.load %arg4[%c0_19, %c0_20] : memref<32x8xf32, #tpu.memory_space<vmem>>, vector<32x8xf32>
    tpu.vector_store %arg4[%c0_19, %c0_20], %62 {strides = array<i32>} : memref<32x8xf32, #tpu.memory_space<vmem>>, vector<32x8xf32>,
    return
  }
}

</mosaic_0001>

<bundles_post_ra>
// kernel: re_attention.1
= control target key start
LH: loop header
LB: loop body
LE: loop exit
PB: predicated region body
PF: predicated region fallthrough
CT: control target
= control target key end

     0   :  { %9 = vsyncpa [#allocation3], 0  ;;  %s2041_s0 = inlined_call_operand.hbm [shape: f32[16,8], index: 0, kind: input, shape index: {}]   ;;  %s2042_s1 = inlined_call_operand.vmem [shape: f32[8,24], index: 1, kind: input, shape index: {}]   ;;  %s2043_s2 = inlined_call_operand.hbm [shape: f32[8,8], index: 2, kind: input, shape index: {}]   ;;  %s2044_s3 = inlined_call_operand.vmem [shape: f32[1,8], index: 3, kind: input, shape index: {}]   ;;  %s2045_s4 = inlined_call_operand.hbm [shape: f32[32,8], index: 4, kind: output, shape index: {}]  }
   0x1   :  { %10 = vsyncpa [#allocation6], 0 }
   0x2   :  { %11 = vsyncpa [#allocation4], 0  ;;  %s1513_s15 = smov [#allocation2]   ;;  %s1441_s19 = scalar_lea.hbm %s2041_s0, 256 }
   0x3   :  { %s17_s16 = sshll.u32 %s1513_s15, 4  ;;  %p1442_p0 = scmp.ne.s32.totalorder %s2041_s0, %s1441_s19  ;;  %s18_s16 = int_to_ptr.vmem [resolvable:$true] %s17_s16 }
   0x4   :  { %p1445_p1 = scmp.lt.u32.totalorder %s1441_s19, %s2041_s0 }
   0x6   :  { %p1447_p2 = pnand %p1445_p1, %p1442_p0 }
   0x8   :  { %1450 = shalt.err (!%p1447_p2)
}
   0x9   :  { %s1451_s24 = scalar_lea.vmem %s18_s16, 256  ;;  %p1456_p4 = scmp.lt.s32.totalorder %s18_s16, %s18_s16 }
   0xa   :  { %p1452_p3 = scmp.ne.s32.totalorder %s18_s16, %s1451_s24  ;;  %p1457_p5 = scmp.lt.s32.totalorder %s1451_s24, %s1451_s24 }
   0xc   :  { %p1458_p6 = por %p1457_p5, %p1456_p4 }
   0xe   :  { %p1459_p7 = pnand %p1458_p6, %p1452_p3 }
  0x10   :  { %1462 = shalt.err (!%p1459_p7)
}
  0x11   :  { %s1514_s25 = smov 128   ;;  %s1515_s26 = smov 8  }
  0x12   :  { %23 = dma.hbm_to_vmem [thread:$0]  %s2041_s0, 256, %s18_s16, [#allocation3], %s1514_s25, %s1514_s25, %s1515_s26  }
  0x13   :  { %s1516_s29 = smov [#allocation5]   ;;  %s1463_s7 = scalar_lea.hbm %s2043_s2, 128 }
  0x14   :  { %s32_s30 = sshll.u32 %s1516_s29, 4  ;;  %p1464_p8 = scmp.ne.s32.totalorder %s2043_s2, %s1463_s7  ;;  %s33_s30 = int_to_ptr.vmem [resolvable:$true] %s32_s30 }
  0x15   :  { %p1467_p9 = scmp.lt.u32.totalorder %s1463_s7, %s2043_s2 }
  0x17   :  { %p1469_p10 = pnand %p1467_p9, %p1464_p8 }
  0x19   :  { %1472 = shalt.err (!%p1469_p10)
}
  0x1a   :  { %s1473_s12 = scalar_lea.vmem %s33_s30, 128  ;;  %p1478_p12 = scmp.lt.s32.totalorder %s33_s30, %s33_s30 }
  0x1b   :  { %p1474_p11 = scmp.ne.s32.totalorder %s33_s30, %s1473_s12  ;;  %p1479_p13 = scmp.lt.s32.totalorder %s1473_s12, %s1473_s12 }
  0x1d   :  { %p1480_p0 = por %p1479_p13, %p1478_p12 }
  0x1f   :  { %p1481_p1 = pnand %p1480_p0, %p1474_p11 }
  0x21   :  { %1484 = shalt.err (!%p1481_p1)
}
  0x22   :  { %35 = dma.hbm_to_vmem [thread:$0]  %s2043_s2, 128, %s33_s30, [#allocation6]  }
  0x23   :  { %1507 = dma.done.wait [#allocation3], 256  }
  0x24   :  { %1508 = vsyncadd [#allocation3], 4294967040 }
  0x25   :  { %1509 = dma.done.wait [#allocation6], 128  }
  0x26   :  { %1510 = vsyncadd [#allocation6], 4294967168  ;;  %vm49_vm0 = vcmask 64512   ;;  %v46_v0 = vld [vmem:[%s2042_s1] sm:$0xff]  ;;  %v45_v2 = vld [vmem:[#allocation2 + $0x8] sm:$0xff]  ;;  %v131_v3 = vlaneseq  ;;  %vm439_vm1 = vcmask 130112  }
  0x27   :  { %v44_v1 = vld [vmem:[#allocation2] sm:$0xff]  ;;  %1348 = vmatprep.subr.mxu0 %v46_v0  ;;  %v1517_v5 = vmov 1966171168   ;;  %s1518_s1 = smov 120   ;;  %vm1520_vm3 = vmmov 0   ;;  %vm951_vm4 = vcmask 1041409  }
  0x28   :  { %1350 = vmatprep.mubr.msk.f32.mxu0 %vm49_vm0, %v44_v1  ;;  %1349 = vmatpush3.msra.mxu0 %v46_v0  ;;  %v1580_v4 = vshrl.u32 %v131_v3, 7  ;;  %v247_v6 = vunpack.c.l.s4 %v1517_v5  ;;  %vm953_vm5 = vcmask 1042434   ;;  %vm955_vm6 = vcmask 1043459  }
  0x29   :  { %1351 = vmatmul.mubr.msk.f32.vlgmr.msra.gmra.mrb[0].mxu0 %vm49_vm0, %v45_v2  ;;  %vm957_vm7 = vcmask 1044484   ;;  %vm959_vm8 = vcmask 1045509   ;;  %vm961_vm9 = vcmask 1046534   ;;  %vm963_vm10 = vcmask 1047559  }
  0x2a   :  { %v1583_v7 = vsub.s32 0, %v1580_v4  ;;  %v140_v8 = vsub.s32 1, %v1580_v4  ;;  %v248_v9 = vunpack.c.0.s8 %v247_v6  ;;  %v147_v11 = vsub.s32 2, %v1580_v4 }
  0x2b   :  { %v154_v16 = vsub.s32 3, %v1580_v4  ;;  %v161_v17 = vsub.s32 4, %v1580_v4  ;;  %v168_v42 = vsub.s32 5, %v1580_v4  ;;  %v175_v1 = vsub.s32 6, %v1580_v4 }
  0x2c   :  { %v251_v15 = vsub.s32 %v248_v9, %v1580_v4 }
  0xfc   :  { %v1586_v10 = vpop.f32.mrb[0].mxu0 }
  0xfd   :  { %v1589_v12 = vpop.f32.mrb[1].mxu0  ;;  %v197_v13 = vrot.slane %v1586_v10, %v140_v8  ;;  %v190_v14 = vrot.slane %v1586_v10, %v1583_v7  ;;  %v204_v18 = vrot.slane %v1586_v10, %v147_v11  ;;  %v301_v20 = vrot.slane %v1586_v10, %v251_v15 }
  0xfe   :  { %v148_v19 = vrot.slane %v1589_v12, %v147_v11  ;;  %v252_v21 = vrot.slane %v1589_v12, %v251_v15  ;;  %v294_v22 = vcombine.high %v1586_v10, %v1586_v10  ;;  %v211_v23 = vrot.slane %v1586_v10, %v154_v16 }
  0xff   :  { %199 = vbcast.lane.b32.xlu0 %v197_v13, 256  ;;  %192 = vbcast.lane.b32.xlu1 %v190_v14, 256  ;;  %v155_v24 = vrot.slane %v1589_v12, %v154_v16  ;;  %v218_v25 = vrot.slane %v1586_v10, %v161_v17  ;;  %v245_v26 = vcombine.high %v1589_v12, %v1589_v12  ;;  %v182_v14 = vsub.s32 7, %v1580_v4 }
 0x100   :  { %v309_v27 = vcombine.high %v301_v20, %v301_v20  ;;  %v317_v28 = vrot.slane %v301_v20, %v251_v15  ;;  %v268_v29 = vrot.slane %v252_v21, %v251_v15  ;;  %v162_v30 = vrot.slane %v1589_v12, %v161_v17 }
 0x101   :  { %v260_v31 = vcombine.high %v252_v21, %v252_v21  ;;  %v308_v32 = vrot.slane %v294_v22, %v251_v15  ;;  %v259_v33 = vrot.slane %v245_v26, %v251_v15  ;;  %v169_v63 = vrot.slane %v1589_v12, %v168_v42 }
 0x102   :  { %v331_v34 = vrot.slane %v309_v27, %v251_v15  ;;  %v1612_v35 = vrot.slane %v317_v28, %v1583_v7  ;;  %v339_v36 = vcombine.high %v317_v28, %v317_v28  ;;  %v290_v37 = vcombine.high %v268_v29, %v268_v29 }
 0x103   :  { %206 = vbcast.lane.b32.xlu0 %v204_v18, 256  ;;  %150 = vbcast.lane.b32.xlu1 %v148_v19, 256  ;;  %v282_v38 = vrot.slane %v260_v31, %v251_v15  ;;  %v324_v39 = vrot.slane %v308_v32, %v251_v15  ;;  %v275_v40 = vrot.slane %v259_v33, %v251_v15 }
 0x104   :  { %v261_v41 = vcombine.high %v259_v33, %v259_v33  ;;  %v1616_v43 = vrot.slane %v331_v34, %v1583_v7  ;;  %v1619_v44 = vrot.slane %v339_v36, %v1583_v7  ;;  %v1622_v45 = vrot.slane %v290_v37, %v1583_v7 }
 0x105   :  { %v341_v46 = vcombine.high %v331_v34, %v331_v34  ;;  %v292_v47 = vcombine.high %v282_v38, %v282_v38  ;;  %v1625_v48 = vrot.slane %v324_v39, %v1583_v7  ;;  %v1628_v49 = vrot.slane %v275_v40, %v1583_v7 }
 0x106   :  { %v289_v50 = vrot.slane %v261_v41, %v251_v15  ;;  %v1631_v51 = vrot.slane %v268_v29, %v1583_v7  ;;  %v291_v52 = vcombine.high %v275_v40, %v275_v40  ;;  %v1634_v53 = vrot.slane %v282_v38, %v1583_v7 }
 0x107   :  { %213 = vbcast.lane.b32.xlu0 %v211_v23, 256  ;;  %157 = vbcast.lane.b32.xlu1 %v155_v24, 256  ;;  %v1637_v54 = vrot.slane %v341_v46, %v1583_v7  ;;  %v1640_v55 = vrot.slane %v292_v47, %v1583_v7  ;;  %v310_v56 = vcombine.high %v308_v32, %v308_v32 }
 0x108   :  { %v340_v57 = vcombine.high %v324_v39, %v324_v39  ;;  %v1643_v58 = vrot.slane %v289_v50, %v1583_v7  ;;  %v1646_v59 = vrot.slane %v291_v52, %v1583_v7  ;;  %v293_v60 = vcombine.high %v289_v50, %v289_v50 }
 0x109   :  { %v338_v61 = vrot.slane %v310_v56, %v251_v15  ;;  %v134_v0 = vrot.slane %v1589_v12, %v1583_v7  ;;  %v176_v11 = vrot.slane %v1589_v12, %v175_v1  ;;  %v141_v13 = vrot.slane %v1589_v12, %v140_v8 }
 0x10a   :  { %v1649_v62 = vrot.slane %v340_v57, %v1583_v7  ;;  %v1656_v2 = vrot.slane %v293_v60, %v1583_v7  ;;  %v183_v15 = vrot.slane %v1589_v12, %v182_v14  ;;  %v225_v16 = vrot.slane %v1586_v10, %v168_v42 }
 0x10b   :  { %220 = vbcast.lane.b32.xlu0 %v218_v25, 256  ;;  %164 = vbcast.lane.b32.xlu1 %v162_v30, 256  ;;  %v1659_v5 = vrot.slane %v338_v61, %v1583_v7  ;;  %v342_v6 = vcombine.high %v338_v61, %v338_v61  ;;  %v239_v17 = vrot.slane %v1586_v10, %v182_v14 }
 0x10d   :  { %v1662_v9 = vrot.slane %v342_v6, %v1583_v7  ;;  %v232_v7 = vrot.slane %v1586_v10, %v175_v1 }
 0x10f   :  { %171 = vbcast.lane.b32.xlu1 %v169_v63, 256  ;;  %136 = vbcast.lane.b32.xlu0 %v134_v0, 256 }
 0x113   :  { %178 = vbcast.lane.b32.xlu1 %v176_v11, 256  ;;  %143 = vbcast.lane.b32.xlu0 %v141_v13, 256 }
 0x117   :  { %185 = vbcast.lane.b32.xlu1 %v183_v15, 256  ;;  %227 = vbcast.lane.b32.xlu0 %v225_v16, 256 }
 0x11b   :  { %241 = vbcast.lane.b32.xlu1 %v239_v17, 256  ;;  %234 = vbcast.lane.b32.xlu0 %v232_v7, 256 }
 0x171   :  { %v200_v18 = vpop.permute.xlu0 %199  ;;  %v193_v19 = vpop.permute.xlu1 %192 }
 0x172   :  { %v1674_v8 = vmul.f32 %v1616_v43, %v200_v18  ;;  %v1677_v20 = vmul.f32 %v1612_v35, %v193_v19 }
 0x174   :  { %v467_v12 = vsel %vm439_vm1, %v1674_v8, -inf  ;;  %v464_v21 = vsel %vm439_vm1, %v1677_v20, -inf }
 0x175   :  { %v207_v22 = vpop.permute.xlu0 %206  ;;  %468 = vmax.xlane.f32.xlu1 %v467_v12  ;;  %v151_v10 = vpop.permute.xlu1 %150  ;;  %465 = vmax.xlane.f32.xlu0 %v464_v21 }
 0x176   :  { %v1684_v23 = vmul.f32 %v1619_v44, %v207_v22  ;;  %v1702_v36 = vmul.f32 %v1622_v45, %v151_v10 }
 0x178   :  { %v470_v24 = vsel %vm439_vm1, %v1684_v23, -inf  ;;  %v446_v42 = vsel %vm439_vm1, %v1702_v36, -inf }
 0x179   :  { %v214_v25 = vpop.permute.xlu0 %213  ;;  %471 = vmax.xlane.f32.xlu1 %v470_v24  ;;  %v158_v27 = vpop.permute.xlu1 %157 }
 0x17a   :  { %v1689_v26 = vmul.f32 %v1637_v54, %v214_v25  ;;  %v1710_v41 = vmul.f32 %v1640_v55, %v158_v27 }
 0x17c   :  { %v473_v28 = vsel %vm439_vm1, %v1689_v26, -inf  ;;  %v449_v56 = vsel %vm439_vm1, %v1710_v41, -inf }
 0x17d   :  { %v221_v29 = vpop.permute.xlu0 %220  ;;  %474 = vmax.xlane.f32.xlu1 %v473_v28  ;;  %v165_v32 = vpop.permute.xlu1 %164 }
 0x17e   :  { %v1694_v30 = vmul.f32 %v1625_v48, %v221_v29  ;;  %v1720_v52 = vmul.f32 %v1628_v49, %v165_v32 }
 0x180   :  { %v476_v31 = vsel %vm439_vm1, %v1694_v30, -inf  ;;  %v452_v1 = vsel %vm439_vm1, %v1720_v52, -inf }
 0x181   :  { %477 = vmax.xlane.f32.xlu1 %v476_v31  ;;  %v137_v33 = vpop.permute.xlu0 %136  ;;  %v172_v40 = vpop.permute.xlu1 %171 }
 0x182   :  { %v1699_v34 = vmul.f32 %v1631_v51, %v137_v33  ;;  %v1730_v0 = vmul.f32 %v1643_v58, %v172_v40 }
 0x184   :  { %v440_v37 = vsel %vm439_vm1, %v1699_v34, -inf  ;;  %v455_v14 = vsel %vm439_vm1, %v1730_v0, -inf }
 0x185   :  { %441 = vmax.xlane.f32.xlu0 %v440_v37  ;;  %v144_v38 = vpop.permute.xlu0 %143  ;;  %v179_v60 = vpop.permute.xlu1 %178 }
 0x186   :  { %v1707_v39 = vmul.f32 %v1634_v53, %v144_v38  ;;  %v1737_v13 = vmul.f32 %v1646_v59, %v179_v60 }
 0x188   :  { %v443_v46 = vsel %vm439_vm1, %v1707_v39, -inf  ;;  %v458_v16 = vsel %vm439_vm1, %v1737_v13, -inf }
 0x189   :  { %447 = vmax.xlane.f32.xlu0 %v446_v42  ;;  %444 = vmax.xlane.f32.xlu1 %v443_v46  ;;  %v228_v47 = vpop.permute.xlu0 %227  ;;  %v186_v11 = vpop.permute.xlu1 %185 }
 0x18a   :  { %v1717_v50 = vmul.f32 %v1659_v5, %v228_v47  ;;  %v1742_v15 = vmul.f32 %v1656_v2, %v186_v11 }
 0x18c   :  { %v479_v57 = vsel %vm439_vm1, %v1717_v50, -inf  ;;  %v461_v18 = vsel %vm439_vm1, %v1742_v15, -inf }
 0x18d   :  { %450 = vmax.xlane.f32.xlu0 %v449_v56  ;;  %480 = vmax.xlane.f32.xlu1 %v479_v57  ;;  %v235_v61 = vpop.permute.xlu0 %234  ;;  %v242_v17 = vpop.permute.xlu1 %241 }
 0x18e   :  { %v1727_v63 = vmul.f32 %v1649_v62, %v235_v61  ;;  %v1747_v7 = vmul.f32 %v1662_v9, %v242_v17 }
 0x190   :  { %v482_v6 = vsel %vm439_vm1, %v1727_v63, -inf  ;;  %v485_v19 = vsel %vm439_vm1, %v1747_v7, -inf }
 0x191   :  { %453 = vmax.xlane.f32.xlu0 %v452_v1  ;;  %483 = vmax.xlane.f32.xlu1 %v482_v6 }
 0x195   :  { %456 = vmax.xlane.f32.xlu0 %v455_v14 }
 0x199   :  { %459 = vmax.xlane.f32.xlu0 %v458_v16 }
 0x19d   :  { %462 = vmax.xlane.f32.xlu0 %v461_v18 }
 0x1a1   :  { %486 = vmax.xlane.f32.xlu0 %v485_v19 }
 0x1a2   :  { %728 = vrot.lane.b32.xlu1 %v1631_v51, %s1518_s1 }
 0x1a6   :  { %732 = vrot.lane.b32.xlu1 %v1622_v45, %s1518_s1 }
 0x1aa   :  { %744 = vrot.lane.b32.xlu1 %v1612_v35, %s1518_s1 }
 0x1ae   :  { %734 = vrot.lane.b32.xlu1 %v1640_v55, %s1518_s1 }
 0x1b7   :  { %730 = vrot.lane.b32.xlu0 %v1634_v53, %s1518_s1 }
 0x1bb   :  { %746 = vrot.lane.b32.xlu0 %v1616_v43, %s1518_s1 }
 0x202   :  { %v469_v12 = vpop.xlane.xlu1 %468  ;;  %v466_v21 = vpop.xlane.xlu0 %465 }
 0x203   :  { %v497_v22 = vsub.f32 %v1674_v8, %v469_v12  ;;  %v496_v51 = vsub.f32 %v1677_v20, %v466_v21 }
 0x205   :  { %v522_v10 = vmul.f32 1.442695, %v497_v22  ;;  %v520_v45 = vmul.f32 1.442695, %v496_v51 }
 0x206   :  { %v472_v24 = vpop.xlane.xlu1 %471 }
 0x207   :  { %1377 = vpow2.f32 %v522_v10  ;;  %v498_v35 = vsub.f32 %v1684_v23, %v472_v24 }
 0x208   :  { %1379 = vpow2.f32 %v520_v45 }
 0x209   :  { %v524_v55 = vmul.f32 1.442695, %v498_v35 }
 0x20a   :  { %v475_v25 = vpop.xlane.xlu1 %474 }
 0x20b   :  { %1381 = vpow2.f32 %v524_v55  ;;  %v499_v53 = vsub.f32 %v1689_v26, %v475_v25 }
 0x20d   :  { %v526_v27 = vmul.f32 1.442695, %v499_v53 }
 0x20e   :  { %v478_v43 = vpop.xlane.xlu1 %477 }
 0x20f   :  { %1383 = vpow2.f32 %v526_v27  ;;  %v500_v28 = vsub.f32 %v1694_v30, %v478_v43 }
 0x211   :  { %v1770_v8 = vpop.eup %1377  ;;  %v528_v20 = vmul.f32 1.442695, %v500_v28 }
 0x212   :  { %v1772_v29 = vpop.eup %1379  ;;  %570 = vrot.lane.b32.xlu0 %v1770_v8, %s1518_s1  ;;  %v442_v23 = vpop.xlane.xlu0 %441 }
 0x213   :  { %1385 = vpow2.f32 %v528_v20  ;;  %568 = vrot.lane.b32.xlu1 %v1772_v29, %s1518_s1 }
 0x215   :  { %v1778_v31 = vpop.eup %1381 }
 0x216   :  { %572 = vrot.lane.b32.xlu0 %v1778_v31, %s1518_s1  ;;  %v445_v26 = vpop.xlane.xlu1 %444  ;;  %v448_v30 = vpop.xlane.xlu0 %447 }
 0x217   :  { %v489_v56 = vsub.f32 %v1707_v39, %v445_v26  ;;  %v490_v12 = vsub.f32 %v1702_v36, %v448_v30 }
 0x219   :  { %v1782_v32 = vpop.eup %1383  ;;  %v506_v1 = vmul.f32 1.442695, %v489_v56  ;;  %v508_v21 = vmul.f32 1.442695, %v490_v12 }
 0x21a   :  { %574 = vrot.lane.b32.xlu0 %v1782_v32, %s1518_s1  ;;  %v481_v33 = vpop.xlane.xlu1 %480  ;;  %v451_v37 = vpop.xlane.xlu0 %450 }
 0x21b   :  { %v501_v38 = vsub.f32 %v1717_v50, %v481_v33  ;;  %v491_v22 = vsub.f32 %v1710_v41, %v451_v37 }
 0x21d   :  { %v1787_v40 = vpop.eup %1385  ;;  %v530_v42 = vmul.f32 1.442695, %v501_v38 }
 0x21e   :  { %576 = vrot.lane.b32.xlu0 %v1787_v40, %s1518_s1  ;;  %v484_v46 = vpop.xlane.xlu1 %483  ;;  %v454_v47 = vpop.xlane.xlu0 %453 }
 0x21f   :  { %1387 = vpow2.f32 %v530_v42  ;;  %v502_v57 = vsub.f32 %v1727_v63, %v484_v46  ;;  %v488_v63 = vsub.f32 %v1699_v34, %v442_v23  ;;  %v510_v34 = vmul.f32 1.442695, %v491_v22 }
 0x221   :  { %v532_v60 = vmul.f32 1.442695, %v502_v57  ;;  %v504_v19 = vmul.f32 1.442695, %v488_v63 }
 0x222   :  { %v457_v61 = vpop.xlane.xlu0 %456  ;;  %v1857_v25 = vpop.permute.xlu1 %728 }
 0x223   :  { %1389 = vpow2.f32 %v532_v60  ;;  %v493_v36 = vsub.f32 %v1730_v0, %v457_v61 }
 0x224   :  { %1391 = vpow2.f32 %v506_v1 }
 0x226   :  { %v460_v6 = vpop.xlane.xlu0 %459  ;;  %v1859_v53 = vpop.permute.xlu1 %732 }
 0x229   :  { %v1793_v50 = vpop.eup %1387 }
 0x22a   :  { %578 = vrot.lane.b32.xlu0 %v1793_v50, %s1518_s1  ;;  %v463_v11 = vpop.xlane.xlu0 %462  ;;  %v1863_v43 = vpop.permute.xlu1 %744 }
 0x22b   :  { %v495_v45 = vsub.f32 %v1742_v15, %v463_v11 }
 0x22d   :  { %v1797_v14 = vpop.eup %1389  ;;  %v518_v0 = vmul.f32 1.442695, %v495_v45 }
 0x22e   :  { %580 = vrot.lane.b32.xlu0 %v1797_v14, %s1518_s1  ;;  %v487_v39 = vpop.xlane.xlu0 %486  ;;  %v1803_v17 = vpop.eup %1391 }
 0x22f   :  { %v503_v16 = vsub.f32 %v1747_v7, %v487_v39  ;;  %v492_v7 = vsub.f32 %v1720_v52, %v454_v47  ;;  %v494_v52 = vsub.f32 %v1737_v13, %v460_v6  ;;  %v1867_v20 = vpop.permute.xlu1 %734 }
 0x231   :  { %v534_v18 = vmul.f32 1.442695, %v503_v16 }
 0x232   :  { %554 = vrot.lane.b32.xlu0 %v1803_v17, %s1518_s1  ;;  %v1861_v27 = vpop.permute.xlu0 %730 }
 0x233   :  { %1393 = vpow2.f32 %v534_v18 }
 0x234   :  { %1395 = vpow2.f32 %v504_v19 }
 0x235   :  { %1397 = vpow2.f32 %v508_v21 }
 0x236   :  { %748 = vrot.lane.b32.xlu0 %v1619_v44, %s1518_s1  ;;  %1399 = vpow2.f32 %v510_v34  ;;  %v512_v44 = vmul.f32 1.442695, %v492_v7  ;;  %v1865_v28 = vpop.permute.xlu0 %746 }
 0x238   :  { %1401 = vpow2.f32 %v512_v44 }
 0x23a   :  { %750 = vrot.lane.b32.xlu0 %v1637_v54, %s1518_s1  ;;  %v514_v54 = vmul.f32 1.442695, %v493_v36 }
 0x23c   :  { %1403 = vpow2.f32 %v514_v54 }
 0x23d   :  { %v1814_v51 = vpop.eup %1393 }
 0x23e   :  { %752 = vrot.lane.b32.xlu0 %v1625_v48, %s1518_s1  ;;  %582 = vrot.lane.b32.xlu1 %v1814_v51, %s1518_s1  ;;  %v1821_v41 = vpop.eup %1395  ;;  %v516_v48 = vmul.f32 1.442695, %v494_v52 }
 0x23f   :  { %v1826_v10 = vpop.eup %1397 }
 0x240   :  { %v1831_v24 = vpop.eup %1399  ;;  %1405 = vpow2.f32 %v516_v48 }
 0x241   :  { %1407 = vpow2.f32 %v518_v0 }
 0x242   :  { %552 = vrot.lane.b32.xlu1 %v1821_v41, %s1518_s1  ;;  %v1835_v35 = vpop.eup %1401 }
 0x246   :  { %556 = vrot.lane.b32.xlu1 %v1826_v10, %s1518_s1  ;;  %v1839_v13 = vpop.eup %1403 }
 0x24a   :  { %558 = vrot.lane.b32.xlu1 %v1831_v24, %s1518_s1  ;;  %v1843_v55 = vpop.eup %1405 }
 0x24b   :  { %v1847_v15 = vpop.eup %1407 }
 0x24e   :  { %560 = vrot.lane.b32.xlu1 %v1835_v35, %s1518_s1 }
 0x252   :  { %562 = vrot.lane.b32.xlu1 %v1839_v13, %s1518_s1 }
 0x256   :  { %564 = vrot.lane.b32.xlu1 %v1843_v55, %s1518_s1 }
 0x25a   :  { %566 = vrot.lane.b32.xlu1 %v1847_v15, %s1518_s1 }
 0x25e   :  { %736 = vrot.lane.b32.xlu1 %v1628_v49, %s1518_s1 }
 0x262   :  { %738 = vrot.lane.b32.xlu1 %v1643_v58, %s1518_s1 }
 0x266   :  { %740 = vrot.lane.b32.xlu1 %v1646_v59, %s1518_s1 }
 0x284   :  { %v571_v23 = vpop.permute.xlu0 %570 }
 0x285   :  { %v569_v49 = vpop.permute.xlu1 %568  ;;  %v627_v59 = vsel %vm49_vm0, %v571_v23, 0.0 }
 0x286   :  { %v624_v26 = vsel %vm49_vm0, %v569_v49, 0.0 }
 0x287   :  { %625 = vadd.xlane.f32.xlu0 %v624_v26 }
 0x288   :  { %v573_v58 = vpop.permute.xlu0 %572 }
 0x289   :  { %v630_v33 = vsel %vm49_vm0, %v573_v58, 0.0 }
 0x28a   :  { %628 = vadd.xlane.f32.xlu1 %v627_v59 }
 0x28c   :  { %v575_v30 = vpop.permute.xlu0 %574 }
 0x28d   :  { %v633_v37 = vsel %vm49_vm0, %v575_v30, 0.0 }
 0x28e   :  { %631 = vadd.xlane.f32.xlu1 %v630_v33 }
 0x290   :  { %v577_v38 = vpop.permute.xlu0 %576 }
 0x291   :  { %v636_v42 = vsel %vm49_vm0, %v577_v38, 0.0 }
 0x292   :  { %634 = vadd.xlane.f32.xlu1 %v633_v37 }
 0x296   :  { %637 = vadd.xlane.f32.xlu1 %v636_v42 }
 0x29c   :  { %v579_v46 = vpop.permute.xlu0 %578 }
 0x29d   :  { %v639_v47 = vsel %vm49_vm0, %v579_v46, 0.0 }
 0x29e   :  { %640 = vadd.xlane.f32.xlu1 %v639_v47 }
 0x2a0   :  { %v581_v56 = vpop.permute.xlu0 %580 }
 0x2a1   :  { %v642_v57 = vsel %vm49_vm0, %v581_v56, 0.0 }
 0x2a2   :  { %643 = vadd.xlane.f32.xlu1 %v642_v57 }
 0x2a4   :  { %v555_v60 = vpop.permute.xlu0 %554 }
 0x2a5   :  { %v603_v61 = vsel %vm49_vm0, %v555_v60, 0.0 }
 0x2a6   :  { %604 = vadd.xlane.f32.xlu1 %v603_v61 }
 0x2b0   :  { %v583_v1 = vpop.permute.xlu1 %582 }
 0x2b1   :  { %v645_v6 = vsel %vm49_vm0, %v583_v1, 0.0 }
 0x2b2   :  { %646 = vadd.xlane.f32.xlu0 %v645_v6 }
 0x2b4   :  { %v553_v11 = vpop.permute.xlu1 %552 }
 0x2b5   :  { %v600_v39 = vsel %vm49_vm0, %v553_v11, 0.0 }
 0x2b6   :  { %601 = vadd.xlane.f32.xlu0 %v600_v39 }
 0x2b7   :  { %742 = vrot.lane.b32.xlu1 %v1656_v2, %s1518_s1 }
 0x2b8   :  { %v557_v63 = vpop.permute.xlu1 %556 }
 0x2b9   :  { %v606_v16 = vsel %vm49_vm0, %v557_v63, 0.0 }
 0x2ba   :  { %607 = vadd.xlane.f32.xlu0 %v606_v16 }
 0x2bb   :  { %758 = vrot.lane.b32.xlu1 %v1662_v9, %s1518_s1  ;;  %v749_v9 = vpop.permute.xlu0 %748 }
 0x2bc   :  { %v559_v18 = vpop.permute.xlu1 %558 }
 0x2bd   :  { %v609_v19 = vsel %vm49_vm0, %v559_v18, 0.0 }
 0x2be   :  { %610 = vadd.xlane.f32.xlu0 %v609_v19 }
 0x2bf   :  { %v751_v52 = vpop.permute.xlu0 %750 }
 0x2c0   :  { %v561_v12 = vpop.permute.xlu1 %560 }
 0x2c1   :  { %v612_v21 = vsel %vm49_vm0, %v561_v12, 0.0 }
 0x2c2   :  { %613 = vadd.xlane.f32.xlu0 %v612_v21 }
 0x2c3   :  { %v753_v45 = vpop.permute.xlu0 %752 }
 0x2c4   :  { %v563_v22 = vpop.permute.xlu1 %562 }
 0x2c5   :  { %v615_v34 = vsel %vm49_vm0, %v563_v22, 0.0 }
 0x2c6   :  { %616 = vadd.xlane.f32.xlu0 %v615_v34 }
 0x2c8   :  { %v565_v2 = vpop.permute.xlu1 %564 }
 0x2c9   :  { %v618_v7 = vsel %vm49_vm0, %v565_v2, 0.0 }
 0x2ca   :  { %619 = vadd.xlane.f32.xlu0 %v618_v7 }
 0x2cc   :  { %v567_v44 = vpop.permute.xlu1 %566 }
 0x2cd   :  { %v621_v36 = vsel %vm49_vm0, %v567_v44, 0.0 }
 0x2ce   :  { %622 = vadd.xlane.f32.xlu0 %v621_v36 }
 0x2d0   :  { %v1893_v54 = vpop.permute.xlu1 %736 }
 0x2d4   :  { %v1895_v48 = vpop.permute.xlu1 %738 }
 0x2d8   :  { %v1897_v0 = vpop.permute.xlu1 %740 }
 0x2e4   :  { %754 = vrot.lane.b32.xlu0 %v1659_v5, %s1518_s1 }
 0x2e8   :  { %756 = vrot.lane.b32.xlu0 %v1649_v62, %s1518_s1 }
 0x314   :  { %v626_v23 = vpop.xlane.xlu0 %625 }
 0x315   :  { %1409 = vrcp.f32 %v626_v23 }
 0x317   :  { %v629_v49 = vpop.xlane.xlu1 %628 }
 0x318   :  { %1411 = vrcp.f32 %v629_v49 }
 0x31b   :  { %v632_v26 = vpop.xlane.xlu1 %631 }
 0x31c   :  { %1413 = vrcp.f32 %v632_v26 }
 0x31f   :  { %v1410_v58 = vpop.eup %1409  ;;  %v635_v5 = vpop.xlane.xlu1 %634 }
 0x320   :  { %v672_v59 = vmul.f32 %v1410_v58, %v626_v23  ;;  %1415 = vrcp.f32 %v635_v5 }
 0x322   :  { %v1412_v62 = vpop.eup %1411  ;;  %v688_v30 = vsub.f32 2.0, %v672_v59 }
 0x323   :  { %v673_v33 = vmul.f32 %v1412_v62, %v629_v49  ;;  %v638_v37 = vpop.xlane.xlu1 %637 }
 0x324   :  { %v704_v38 = vmul.f32 %v1410_v58, %v688_v30  ;;  %1417 = vrcp.f32 %v638_v37 }
 0x325   :  { %v689_v42 = vsub.f32 2.0, %v673_v33 }
 0x326   :  { %v1414_v46 = vpop.eup %1413  ;;  %v720_v47 = vmul.f32 %v1772_v29, %v704_v38 }
 0x327   :  { %v705_v56 = vmul.f32 %v1412_v62, %v689_v42  ;;  %v674_v57 = vmul.f32 %v1414_v46, %v632_v26 }
 0x328   :  { %v784_v60 = vmul.f32 %v1863_v43, %v720_v47  ;;  %v1272_v11 = vsel %vm439_vm1, %v720_v47, 0.0 }
 0x329   :  { %v690_v61 = vsub.f32 2.0, %v674_v57  ;;  %v721_v1 = vmul.f32 %v1770_v8, %v705_v56 }
 0x32a   :  { %v1416_v6 = vpop.eup %1415  ;;  %824 = vrot.lane.b32.xlu1 %v784_v60, %s1518_s1 }
 0x32b   :  { %v706_v39 = vmul.f32 %v1414_v46, %v690_v61  ;;  %v675_v63 = vmul.f32 %v1416_v6, %v635_v5  ;;  %v641_v16 = vpop.xlane.xlu1 %640  ;;  %v785_v18 = vmul.f32 %v1865_v28, %v721_v1  ;;  %v1273_v19 = vsel %vm439_vm1, %v721_v1, 0.0 }
 0x32c   :  { %1419 = vrcp.f32 %v641_v16  ;;  %v1274_v29 = vadd.f32 %v1273_v19, %v1272_v11 }
 0x32d   :  { %v691_v12 = vsub.f32 2.0, %v675_v63  ;;  %826 = vrot.lane.b32.xlu0 %v785_v18, %s1518_s1  ;;  %v722_v43 = vmul.f32 %v1778_v31, %v706_v39 }
 0x32e   :  { %v1418_v8 = vpop.eup %1417 }
 0x32f   :  { %v707_v21 = vmul.f32 %v1416_v6, %v691_v12  ;;  %v676_v22 = vmul.f32 %v1418_v8, %v638_v37  ;;  %v644_v34 = vpop.xlane.xlu1 %643  ;;  %v786_v2 = vmul.f32 %v749_v9, %v722_v43  ;;  %v1275_v7 = vsel %vm439_vm1, %v722_v43, 0.0 }
 0x330   :  { %1421 = vrcp.f32 %v644_v34  ;;  %v1276_v44 = vadd.f32 %v1275_v7, %v1274_v29 }
 0x331   :  { %v692_v36 = vsub.f32 2.0, %v676_v22  ;;  %828 = vrot.lane.b32.xlu0 %v786_v2, %s1518_s1  ;;  %v723_v28 = vmul.f32 %v1782_v32, %v707_v21 }
 0x333   :  { %v708_v23 = vmul.f32 %v1418_v8, %v692_v36  ;;  %v605_v49 = vpop.xlane.xlu1 %604  ;;  %v787_v26 = vmul.f32 %v751_v52, %v723_v28  ;;  %v1277_v58 = vsel %vm439_vm1, %v723_v28, 0.0 }
 0x334   :  { %1423 = vrcp.f32 %v605_v49  ;;  %v1278_v31 = vadd.f32 %v1277_v58, %v1276_v44 }
 0x335   :  { %830 = vrot.lane.b32.xlu0 %v787_v26, %s1518_s1  ;;  %v724_v9 = vmul.f32 %v1787_v40, %v708_v23 }
 0x336   :  { %v1420_v5 = vpop.eup %1419 }
 0x337   :  { %v677_v59 = vmul.f32 %v1420_v5, %v641_v16  ;;  %v788_v62 = vmul.f32 %v753_v45, %v724_v9  ;;  %v1279_v30 = vsel %vm439_vm1, %v724_v9, 0.0 }
 0x338   :  { %v1280_v33 = vadd.f32 %v1279_v30, %v1278_v31 }
 0x339   :  { %v693_v37 = vsub.f32 2.0, %v677_v59  ;;  %832 = vrot.lane.b32.xlu0 %v788_v62, %s1518_s1 }
 0x33a   :  { %v1422_v32 = vpop.eup %1421 }
 0x33b   :  { %v709_v38 = vmul.f32 %v1420_v5, %v693_v37  ;;  %v678_v52 = vmul.f32 %v1422_v32, %v644_v34 }
 0x33d   :  { %v694_v42 = vsub.f32 2.0, %v678_v52  ;;  %v1917_v46 = vmul.f32 %v1793_v50, %v709_v38 }
 0x33e   :  { %v1424_v47 = vpop.eup %1423 }
 0x33f   :  { %v710_v56 = vmul.f32 %v1422_v32, %v694_v42  ;;  %v665_v57 = vmul.f32 %v1424_v47, %v605_v49  ;;  %v647_v40 = vpop.xlane.xlu0 %646  ;;  %v1281_v45 = vsel %vm439_vm1, %v1917_v46, 0.0 }
 0x340   :  { %1425 = vrcp.f32 %v647_v40  ;;  %v1282_v60 = vadd.f32 %v1281_v45, %v1280_v33 }
 0x341   :  { %v681_v61 = vsub.f32 2.0, %v665_v57  ;;  %v1922_v1 = vmul.f32 %v1797_v14, %v710_v56 }
 0x343   :  { %v697_v6 = vmul.f32 %v1424_v47, %v681_v61  ;;  %v602_v11 = vpop.xlane.xlu0 %601  ;;  %v1283_v39 = vsel %vm439_vm1, %v1922_v1, 0.0 }
 0x344   :  { %1427 = vrcp.f32 %v602_v11  ;;  %v1284_v50 = vadd.f32 %v1283_v39, %v1282_v60 }
 0x345   :  { %v713_v63 = vmul.f32 %v1803_v17, %v697_v6 }
 0x347   :  { %v608_v16 = vpop.xlane.xlu0 %607  ;;  %v777_v18 = vmul.f32 %v1861_v27, %v713_v63  ;;  %v1247_v58 = vsel %vm439_vm1, %v713_v63, 0.0 }
 0x348   :  { %1429 = vrcp.f32 %v608_v16 }
 0x349   :  { %810 = vrot.lane.b32.xlu1 %v777_v18, %s1518_s1 }
 0x34a   :  { %v1426_v19 = vpop.eup %1425 }
 0x34b   :  { %v679_v29 = vmul.f32 %v1426_v19, %v647_v40  ;;  %v611_v12 = vpop.xlane.xlu0 %610 }
 0x34c   :  { %1431 = vrcp.f32 %v611_v12 }
 0x34d   :  { %v695_v14 = vsub.f32 2.0, %v679_v29 }
 0x34e   :  { %v1428_v43 = vpop.eup %1427 }
 0x34f   :  { %v711_v8 = vmul.f32 %v1426_v19, %v695_v14  ;;  %v664_v21 = vmul.f32 %v1428_v43, %v602_v11  ;;  %v614_v22 = vpop.xlane.xlu0 %613 }
 0x350   :  { %1433 = vrcp.f32 %v614_v22 }
 0x351   :  { %v680_v34 = vsub.f32 2.0, %v664_v21  ;;  %v1930_v2 = vmul.f32 %v1814_v51, %v711_v8 }
 0x352   :  { %v1430_v17 = vpop.eup %1429 }
 0x353   :  { %v696_v7 = vmul.f32 %v1428_v43, %v680_v34  ;;  %v666_v27 = vmul.f32 %v1430_v17, %v608_v16  ;;  %v617_v44 = vpop.xlane.xlu0 %616  ;;  %v1285_v36 = vsel %vm439_vm1, %v1930_v2, 0.0 }
 0x354   :  { %1435 = vrcp.f32 %v617_v44  ;;  %v1934_v28 = vadd.f32 %v1285_v36, %v1284_v50 }
 0x355   :  { %v682_v23 = vsub.f32 2.0, %v666_v27  ;;  %v712_v49 = vmul.f32 %v1821_v41, %v696_v7  ;;  %v743_v7 = vpop.permute.xlu1 %742 }
 0x356   :  { %v1432_v26 = vpop.eup %1431 }
 0x357   :  { %v698_v31 = vmul.f32 %v1430_v17, %v682_v23  ;;  %v667_v9 = vmul.f32 %v1432_v26, %v611_v12  ;;  %v620_v51 = vpop.xlane.xlu0 %619  ;;  %v776_v5 = vmul.f32 %v1857_v25, %v712_v49  ;;  %v1246_v59 = vsel %vm439_vm1, %v712_v49, 0.0 }
 0x358   :  { %1437 = vrcp.f32 %v620_v51  ;;  %v1248_v62 = vadd.f32 %v1247_v58, %v1246_v59 }
 0x359   :  { %v683_v30 = vsub.f32 2.0, %v667_v9  ;;  %808 = vrot.lane.b32.xlu0 %v776_v5, %s1518_s1  ;;  %v714_v33 = vmul.f32 %v1826_v10, %v698_v31  ;;  %v759_v49 = vpop.permute.xlu1 %758 }
 0x35a   :  { %v1434_v37 = vpop.eup %1433 }
 0x35b   :  { %v699_v32 = vmul.f32 %v1432_v26, %v683_v30  ;;  %v668_v41 = vmul.f32 %v1434_v37, %v614_v22  ;;  %v623_v38 = vpop.xlane.xlu0 %622  ;;  %v778_v52 = vmul.f32 %v1859_v53, %v714_v33  ;;  %v1249_v42 = vsel %vm439_vm1, %v714_v33, 0.0 }
 0x35c   :  { %1439 = vrcp.f32 %v623_v38  ;;  %v1250_v47 = vadd.f32 %v1249_v42, %v1248_v62 }
 0x35d   :  { %v684_v25 = vsub.f32 2.0, %v668_v41  ;;  %812 = vrot.lane.b32.xlu0 %v778_v52, %s1518_s1  ;;  %v715_v56 = vmul.f32 %v1831_v24, %v699_v32 }
 0x35e   :  { %v1436_v57 = vpop.eup %1435 }
 0x35f   :  { %v700_v40 = vmul.f32 %v1434_v37, %v684_v25  ;;  %v669_v45 = vmul.f32 %v1436_v57, %v617_v44  ;;  %v755_v60 = vpop.permute.xlu0 %754  ;;  %v779_v10 = vmul.f32 %v1867_v20, %v715_v56  ;;  %v1251_v61 = vsel %vm439_vm1, %v715_v56, 0.0 }
 0x360   :  { %v789_v6 = vmul.f32 %v755_v60, %v1917_v46  ;;  %v1252_v53 = vadd.f32 %v1251_v61, %v1250_v47 }
 0x361   :  { %v685_v11 = vsub.f32 2.0, %v669_v45  ;;  %814 = vrot.lane.b32.xlu1 %v779_v10, %s1518_s1  ;;  %v716_v39 = vmul.f32 %v1835_v35, %v700_v40 }
 0x362   :  { %v1438_v50 = vpop.eup %1437  ;;  %834 = vrot.lane.b32.xlu0 %v789_v6, %s1518_s1 }
 0x363   :  { %v701_v24 = vmul.f32 %v1436_v57, %v685_v11  ;;  %v670_v63 = vmul.f32 %v1438_v50, %v620_v51  ;;  %v757_v16 = vpop.permute.xlu0 %756  ;;  %v780_v18 = vmul.f32 %v1893_v54, %v716_v39  ;;  %v1253_v20 = vsel %vm439_vm1, %v716_v39, 0.0 }
 0x364   :  { %v790_v19 = vmul.f32 %v757_v16, %v1922_v1  ;;  %v1254_v29 = vadd.f32 %v1253_v20, %v1252_v53 }
 0x365   :  { %v686_v46 = vsub.f32 2.0, %v670_v63  ;;  %816 = vrot.lane.b32.xlu1 %v780_v18, %s1518_s1  ;;  %v717_v12 = vmul.f32 %v1839_v13, %v701_v24  ;;  %v907_v24 = vand.u32 127, %v131_v3 }
 0x366   :  { %v1440_v14 = vpop.eup %1439  ;;  %836 = vrot.lane.b32.xlu0 %v790_v19, %s1518_s1 }
 0x367   :  { %v702_v35 = vmul.f32 %v1438_v50, %v686_v46  ;;  %v671_v43 = vmul.f32 %v1440_v14, %v623_v38  ;;  %v781_v8 = vmul.f32 %v1895_v48, %v717_v12  ;;  %v1255_v21 = vsel %vm439_vm1, %v717_v12, 0.0 }
 0x368   :  { %v1256_v54 = vadd.f32 %v1255_v21, %v1254_v29  ;;  %v1519_v50 = vmov 0.0   ;;  %vm908_vm2 = vcmp.eq.s32.totalorder %v1580_v4, %v907_v24 }
 0x369   :  { %v687_v22 = vsub.f32 2.0, %v671_v43  ;;  %818 = vrot.lane.b32.xlu1 %v781_v8, %s1518_s1  ;;  %v718_v1 = vmul.f32 %v1843_v55, %v702_v35  ;;  %v791_v55 = vmul.f32 %v759_v49, %v1930_v2  ;;  %1353 = vmatprep.subr.mxu1 %v1519_v50  ;;  %v1330_v63 = vsel %vm908_vm2, 1.0, %v1519_v50 }
 0x36a   :  { %1358 = vmatprep.subr.mxu0 %v1519_v50  ;;  %1355 = vmatprep.mubr.msk.f32.mxu1 %vm1520_vm3, %v1519_v50  ;;  %v921_v8 = vsub.s32 %v907_v24, %v1580_v4 }
 0x36b   :  { %v703_v34 = vmul.f32 %v1440_v14, %v687_v22  ;;  %v782_v17 = vmul.f32 %v1897_v0, %v718_v1  ;;  %v1257_v13 = vsel %vm439_vm1, %v718_v1, 0.0  ;;  %1360 = vmatprep.mubr.msk.f32.mxu0 %vm1520_vm3, %v1519_v50 }
 0x36c   :  { %v1258_v27 = vadd.f32 %v1257_v13, %v1256_v54 }
 0x36d   :  { %820 = vrot.lane.b32.xlu1 %v782_v17, %s1518_s1  ;;  %v719_v44 = vmul.f32 %v1847_v15, %v703_v34 }
 0x36f   :  { %v783_v48 = vmul.f32 %v743_v7, %v719_v44  ;;  %v1259_v36 = vsel %vm439_vm1, %v719_v44, 0.0 }
 0x370   :  { %v1967_v23 = vadd.f32 %v1259_v36, %v1258_v27 }
 0x371   :  { %822 = vrot.lane.b32.xlu1 %v783_v48, %s1518_s1 }
 0x375   :  { %838 = vrot.lane.b32.xlu1 %v791_v55, %s1518_s1 }
 0x39c   :  { %v825_v0 = vpop.permute.xlu1 %824 }
 0x39d   :  { %v880_v26 = vsel %vm49_vm0, %v825_v0, 0.0 }
 0x39e   :  { %881 = vadd.xlane.f32.xlu0 %v880_v26 }
 0x39f   :  { %v827_v58 = vpop.permute.xlu0 %826 }
 0x3a0   :  { %v883_v31 = vsel %vm49_vm0, %v827_v58, 0.0 }
 0x3a1   :  { %884 = vadd.xlane.f32.xlu1 %v883_v31 }
 0x3a3   :  { %v829_v15 = vpop.permute.xlu0 %828 }
 0x3a4   :  { %v886_v9 = vsel %vm49_vm0, %v829_v15, 0.0 }
 0x3a5   :  { %887 = vadd.xlane.f32.xlu1 %v886_v9 }
 0x3a7   :  { %v831_v51 = vpop.permute.xlu0 %830 }
 0x3a8   :  { %v889_v5 = vsel %vm49_vm0, %v831_v51, 0.0 }
 0x3a9   :  { %890 = vadd.xlane.f32.xlu1 %v889_v5 }
 0x3ab   :  { %v833_v59 = vpop.permute.xlu0 %832 }
 0x3ac   :  { %v892_v2 = vsel %vm49_vm0, %v833_v59, 0.0 }
 0x3ad   :  { %893 = vadd.xlane.f32.xlu1 %v892_v2 }
 0x3bb   :  { %v811_v62 = vpop.permute.xlu1 %810 }
 0x3bc   :  { %v859_v30 = vsel %vm49_vm0, %v811_v62, 0.0 }
 0x3bd   :  { %860 = vadd.xlane.f32.xlu1 %v859_v30 }
 0x3cb   :  { %v809_v33 = vpop.permute.xlu0 %808 }
 0x3cc   :  { %v856_v37 = vsel %vm49_vm0, %v809_v33, 0.0  ;;  %v47_v33 = vld [vmem:[#allocation5] sm:$0xff] }
 0x3cd   :  { %857 = vadd.xlane.f32.xlu0 %v856_v37 }
 0x3cf   :  { %v813_v32 = vpop.permute.xlu0 %812 }
 0x3d0   :  { %v862_v41 = vsel %vm49_vm0, %v813_v32, 0.0 }
 0x3d1   :  { %863 = vadd.xlane.f32.xlu0 %v862_v41 }
 0x3d3   :  { %v815_v38 = vpop.permute.xlu1 %814 }
 0x3d4   :  { %v865_v52 = vsel %vm49_vm0, %v815_v38, 0.0  ;;  %v835_v42 = vpop.permute.xlu0 %834 }
 0x3d5   :  { %v895_v47 = vsel %vm49_vm0, %v835_v42, 0.0  ;;  %866 = vadd.xlane.f32.xlu0 %v865_v52 }
 0x3d6   :  { %896 = vadd.xlane.f32.xlu1 %v895_v47 }
 0x3d7   :  { %v817_v25 = vpop.permute.xlu1 %816 }
 0x3d8   :  { %v868_v56 = vsel %vm49_vm0, %v817_v25, 0.0  ;;  %v837_v57 = vpop.permute.xlu0 %836 }
 0x3d9   :  { %v898_v40 = vsel %vm49_vm0, %v837_v57, 0.0  ;;  %869 = vadd.xlane.f32.xlu0 %v868_v56 }
 0x3da   :  { %899 = vadd.xlane.f32.xlu1 %v898_v40 }
 0x3db   :  { %v819_v45 = vpop.permute.xlu1 %818 }
 0x3dc   :  { %v871_v60 = vsel %vm49_vm0, %v819_v45, 0.0 }
 0x3dd   :  { %872 = vadd.xlane.f32.xlu0 %v871_v60  ;;  %v1335_v60 = vld [vmem:[%s2044_s3] ss:$0 sm:$0xff]  ;;  %s1521_s3 = smov [#allocation7]  }
 0x3de   :  { %s1315_s17 = sshll.u32 %s1521_s3, 4  ;;  %s1316_s17 = int_to_ptr.vmem [resolvable:$true] %s1315_s17 }
 0x3df   :  { %v821_v10 = vpop.permute.xlu1 %820  ;;  %s1485_s18 = scalar_lea.vmem %s1316_s17, 512  ;;  %p1490_p3 = scmp.lt.s32.totalorder %s1316_s17, %s1316_s17 }
 0x3e0   :  { %v874_v61 = vsel %vm49_vm0, %v821_v10, 0.0  ;;  %p1486_p2 = scmp.ne.s32.totalorder %s1316_s17, %s1485_s18  ;;  %p1491_p4 = scmp.lt.s32.totalorder %s1485_s18, %s1485_s18 }
 0x3e1   :  { %875 = vadd.xlane.f32.xlu0 %v874_v61 }
 0x3e2   :  { %p1492_p5 = por %p1491_p4, %p1490_p3 }
 0x3e3   :  { %v823_v6 = vpop.permute.xlu1 %822 }
 0x3e4   :  { %v877_v53 = vsel %vm49_vm0, %v823_v6, 0.0  ;;  %p1493_p6 = pnand %p1492_p5, %p1486_p2 }
 0x3e5   :  { %878 = vadd.xlane.f32.xlu0 %v877_v53 }
 0x3e7   :  { %v839_v11 = vpop.permute.xlu1 %838 }
 0x3e8   :  { %v901_v39 = vsel %vm49_vm0, %v839_v11, 0.0  ;;  %v1261_v11 = vmul.f32 0.5, %v1967_v23 }
 0x3e9   :  { %902 = vadd.xlane.f32.xlu0 %v901_v39  ;;  %v1287_v39 = vmul.f32 0.5, %v1934_v28 }
 0x42b   :  { %v882_v18 = vpop.xlane.xlu0 %881 }
 0x42c   :  { %v1051_v49 = vrot.slane %v882_v18, %v921_v8 }
 0x42e   :  { %v885_v16 = vpop.xlane.xlu1 %884 }
 0x42f   :  { %v1055_v7 = vrot.slane %v885_v16, %v921_v8 }
 0x431   :  { %v1080_v9 = vsel %vm951_vm4, %v1055_v7, %v1051_v49 }
 0x432   :  { %v888_v20 = vpop.xlane.xlu1 %887 }
 0x433   :  { %v1059_v48 = vrot.slane %v888_v20, %v921_v8 }
 0x435   :  { %v1081_v2 = vsel %vm953_vm5, %v1059_v48, %v1080_v9 }
 0x436   :  { %v891_v29 = vpop.xlane.xlu1 %890 }
 0x437   :  { %v1063_v55 = vrot.slane %v891_v29, %v921_v8 }
 0x439   :  { %v1082_v37 = vsel %vm955_vm6, %v1063_v55, %v1081_v2 }
 0x43a   :  { %v894_v14 = vpop.xlane.xlu1 %893 }
 0x43b   :  { %v1067_v58 = vrot.slane %v894_v14, %v921_v8 }
 0x43d   :  { %v1083_v41 = vsel %vm957_vm7, %v1067_v58, %v1082_v37 }
 0x44a   :  { %v861_v43 = vpop.xlane.xlu1 %860 }
 0x44b   :  { %v926_v1 = vrot.slane %v861_v43, %v921_v8 }
 0x45a   :  { %v858_v19 = vpop.xlane.xlu0 %857 }
 0x45b   :  { %v922_v3 = vrot.slane %v858_v19, %v921_v8 }
 0x45d   :  { %v952_v27 = vsel %vm951_vm4, %v926_v1, %v922_v3 }
 0x45e   :  { %v864_v46 = vpop.xlane.xlu0 %863 }
 0x45f   :  { %v930_v22 = vrot.slane %v864_v46, %v921_v8 }
 0x461   :  { %v954_v36 = vsel %vm953_vm5, %v930_v22, %v952_v27 }
 0x462   :  { %v867_v12 = vpop.xlane.xlu0 %866 }
 0x463   :  { %v897_v54 = vpop.xlane.xlu1 %896  ;;  %v934_v34 = vrot.slane %v867_v12, %v921_v8 }
 0x464   :  { %v1071_v51 = vrot.slane %v897_v54, %v921_v8 }
 0x465   :  { %v956_v0 = vsel %vm955_vm6, %v934_v34, %v954_v36 }
 0x466   :  { %v870_v35 = vpop.xlane.xlu0 %869  ;;  %v1084_v52 = vsel %vm959_vm8, %v1071_v51, %v1083_v41 }
 0x467   :  { %v938_v17 = vrot.slane %v870_v35, %v921_v8  ;;  %v900_v26 = vpop.xlane.xlu1 %899 }
 0x468   :  { %v1075_v62 = vrot.slane %v900_v26, %v921_v8 }
 0x469   :  { %v958_v31 = vsel %vm957_vm7, %v938_v17, %v956_v0 }
 0x46a   :  { %v873_v21 = vpop.xlane.xlu0 %872  ;;  %v1085_v47 = vsel %vm961_vm9, %v1075_v62, %v1084_v52 }
 0x46b   :  { %v942_v44 = vrot.slane %v873_v21, %v921_v8 }
 0x46d   :  { %v960_v5 = vsel %vm959_vm8, %v942_v44, %v958_v31 }
 0x46e   :  { %v876_v13 = vpop.xlane.xlu0 %875 }
 0x46f   :  { %v946_v4 = vrot.slane %v876_v13, %v921_v8 }
 0x471   :  { %v962_v30 = vsel %vm961_vm9, %v946_v4, %v960_v5 }
 0x472   :  { %v879_v15 = vpop.xlane.xlu0 %878 }
 0x473   :  { %v950_v59 = vrot.slane %v879_v15, %v921_v8 }
 0x475   :  { %v964_v32 = vsel %vm963_vm10, %v950_v59, %v962_v30 }
 0x476   :  { %1354 = vmatpush3.xpose.msk.msra.mxu1 %vm49_vm0, %v964_v32  ;;  %v903_v38 = vpop.xlane.xlu0 %902 }
 0x477   :  { %v1079_v42 = vrot.slane %v903_v38, %v921_v8  ;;  %1363 = vmatprep.subr.mxu1 %v47_v33 }
 0x479   :  { %v1086_v25 = vsel %vm963_vm10, %v1079_v42, %v1085_v47  ;;  %1356 = vmatmul.mubr.msk.f32.vlgmr.msra.gmra.mrb[0].mxu1 %vm49_vm0, %v1330_v63 }
 0x47a   :  { %1359 = vmatpush3.xpose.msk.msra.mxu0 %vm49_vm0, %v1086_v25  ;;  %1364 = vmatpush3.msra.mxu1 %v47_v33 }
 0x47d   :  { %1361 = vmatmul.mubr.msk.f32.vlgmr.msra.gmra.mrb[2].mxu0 %vm49_vm0, %v1330_v63 }
 0x54c   :  { %v1036_v56 = vpop.f32.mrb[0].mxu1 }
 0x54d   :  { %v1357_v57 = vpop.f32.mrb[1].mxu1  ;;  %1365 = vmatprep.mubr.msk.f32.mxu1 %vm49_vm0, %v1036_v56 }
 0x550   :  { %v1155_v40 = vpop.f32.mrb[2].mxu0 }
 0x551   :  { %v1362_v45 = vpop.f32.mrb[3].mxu0  ;;  %1366 = vmatmul.mubr.msk.f32.vlgmr.msra.gmra.mrb[2].mxu1 %vm49_vm0, %v1155_v40 }
 0x624   :  { %v1367_v10 = vpop.f32.mrb[2].mxu1 }
 0x625   :  { %v1243_v61 = vadd.f32 %v1367_v10, %v1335_v60  ;;  %v1237_v6 = vpop.f32.mrb[3].mxu1 }
 0x626   :  { %v1238_v53 = vadd.f32 %v1335_v60, %v1237_v6 }
 0x627   :  { %1268 = vrot.lane.b32.xlu0 %v1243_v61, %s1515_s26 }
 0x628   :  { %1263 = vrot.lane.b32.xlu1 %v1238_v53, %s1515_s26 }
 0x699   :  { %v1269_v50 = vpop.permute.xlu0 %1268 }
 0x69a   :  { %v1271_v24 = vmul.f32 %v1269_v50, %v1261_v11  ;;  %v1264_v63 = vpop.permute.xlu1 %1263  ;;  %v1289_v20 = vmul.f32 %v1287_v39, %v1269_v50 }
 0x69b   :  { %v1288_v16 = vmul.f32 %v1287_v39, %v1264_v63  ;;  %v1266_v18 = vmul.f32 %v1264_v63, %v1261_v11 }
 0x69c   :  { %1296 = vrot.lane.b32.xlu1 %v1271_v24, %s1518_s1 }
 0x69d   :  { %1298 = vrot.lane.b32.xlu0 %v1288_v16, %s1518_s1 }
 0x6a0   :  { %1294 = vrot.lane.b32.xlu1 %v1266_v18, %s1518_s1 }
 0x6a4   :  { %1300 = vrot.lane.b32.xlu1 %v1289_v20, %s1518_s1 }
 0x70e   :  { %v1297_v19 = vpop.permute.xlu1 %1296 }
 0x70f   :  { %1307 = vst.msk [vmem:[#allocation7 + $0x8] sm:$0xff] %vm49_vm0, %v1297_v19  ;;  %v1299_v23 = vpop.permute.xlu0 %1298 }
 0x710   :  { %1308 = vst.msk [vmem:[#allocation7 + $0x10] sm:$0xff] %vm49_vm0, %v1299_v23 }
 0x712   :  { %v1295_v28 = vpop.permute.xlu1 %1294 }
 0x713   :  { %1306 = vst.msk [vmem:[#allocation7] sm:$0xff] %vm49_vm0, %v1295_v28 }
 0x716   :  { %v1301_v29 = vpop.permute.xlu1 %1300 }
 0x717   :  { %1309 = vst.msk [vmem:[#allocation7 + $0x18] sm:$0xff] %vm49_vm0, %v1301_v29 }
 0x718   :  { %1496 = shalt.err (!%p1493_p6)
}
 0x719   :  { %s1497_s21 = scalar_lea.hbm %s2045_s4, 512 }
 0x71a   :  { %p1498_p7 = scmp.ne.s32.totalorder %s2045_s4, %s1497_s21  ;;  %p1501_p8 = scmp.lt.u32.totalorder %s1497_s21, %s2045_s4 }
 0x71c   :  { %p1503_p9 = pnand %p1501_p8, %p1498_p7 }
 0x71e   :  { %1506 = shalt.err (!%p1503_p9)
}
 0x71f   :  { %1321 = dma.vmem_to_hbm [thread:$0]  %s1316_s17, 512, %s2045_s4, [#allocation4], %s1514_s25, %s1514_s25, %s1515_s26  }
 0x720   :  { %1511 = dma.done.wait [#allocation4], 512  }
 0x721   :  { %1512 = vsyncadd [#allocation4], 4294966784 }
 0x722   :  { %1325 = vsyncpa [#allocation3], 1 }
 0x723   :  { %1326 = vsyncpa [#allocation6], 1 }
 0x724   :  { %1327 = vsyncpa [#allocation4], 1 }

</bundles_post_ra>
